<compile_context>
chip_gen: v6e
topology: v6e:2x2x1
jax: 0.10.0
libtpu: 0.0.40
codegen_flags: <defaults>
</compile_context>

<pallas_src>
import math

import jax
import jax.numpy as jnp
from jax.experimental import pallas as pl
from jax.experimental.pallas import tpu as pltpu

_NEG_HALF_LOG_2PI = -0.5 * math.log(2.0 * math.pi)


def _binary_dist_kernel(nu_ref, z_ref, loc_ref, ls_ref, hiv_ref, out_ref):
    # nu_ref, z_ref, out_ref: (TB, TL); loc_ref, ls_ref, hiv_ref: (1, TL) f32 rows.
    zpos = z_ref[...] > 0                              # (TB, TL) bool, native dtype compare
    loc_eff = jnp.where(zpos, loc_ref[...], 0.0)       # mask * (loc[...,0] + loc[...,1])
    ls_eff = jnp.where(zpos, ls_ref[...], 0.0)
    half_inv_var = jnp.where(zpos, hiv_ref[...], 0.5)  # == 0.5 * exp(-2*ls_eff), precomputed
    diff = nu_ref[...].astype(jnp.float32) - loc_eff
    out_ref[...] = (_NEG_HALF_LOG_2PI - ls_eff
                    - (diff * diff) * half_inv_var).astype(out_ref.dtype)


def _round_up(x, m):
    return ((x + m - 1) // m) * m


def _sublane_granule(dtype):
    # f32 -> 8, bf16/f16 -> 16, int8/fp8 -> 32
    return max(8, 32 // jnp.dtype(dtype).itemsize)


def _pick_tile(dim, cap, granule, min_steps=1):
    """Largest multiple of `granule` that divides `dim`, <= cap, with >= min_steps steps."""
    best = granule
    t = granule
    top = min(cap, dim)
    while t <= top:
        if dim % t == 0 and dim // t >= min_steps:
            best = t
        t += granule
    return best


def _call(nu, z, loc_row, ls_row, hiv_row, tb, tl):
    b, l = nu.shape
    grid = (b // tb, l // tl)
    return pl.pallas_call(
        _binary_dist_kernel,
        out_shape=jax.ShapeDtypeStruct((b, l), jnp.float32),
        grid=grid,
        in_specs=[
            pl.BlockSpec((tb, tl), lambda i, j: (i, j)),   # nu  (native dtype)
            pl.BlockSpec((tb, tl), lambda i, j: (i, j)),   # z   (native dtype)
            pl.BlockSpec((1, tl), lambda i, j: (0, j)),    # loc_sum row
            pl.BlockSpec((1, tl), lambda i, j: (0, j)),    # log_scale_sum row
            pl.BlockSpec((1, tl), lambda i, j: (0, j)),    # 0.5*exp(-2*log_scale_sum) row
        ],
        out_specs=pl.BlockSpec((tb, tl), lambda i, j: (i, j)),
        compiler_params=pltpu.CompilerParams(
            dimension_semantics=("parallel", "parallel"),   # independent tiles -> megacore on v7x
            vmem_limit_bytes=32 * 1024 * 1024),
    )(nu, z, loc_row, ls_row, hiv_row)


def binary_distribution_forward(nu, z, loc, log_scale):
    """nu, z: (B, L); loc, log_scale: (L, 2) parameters. Returns (B, L) f32 log-prob."""
    B, L = nu.shape

    # ---- tiny param preprocessing (O(L), outside the hot path) ----
    loc_sum = jnp.sum(loc.astype(jnp.float32), axis=-1)[None, :]        # (1, L)
    ls_sum = jnp.sum(log_scale.astype(jnp.float32), axis=-1)[None, :]   # (1, L)
    hiv = 0.5 * jnp.exp(-2.0 * ls_sum)                                  # hoisted EUP work

    # ---- lane-packing for small L: (B, L) -> (B//k, k*L), a free contiguous reshape ----
    k = 1
    if L < 128 and 128 % L == 0 and B % (128 // L) == 0:
        k = 128 // L
    Br, Lr = B // k, k * L
    if k > 1:
        nu_r = nu.reshape(Br, Lr)
        z_r = z.reshape(Br, Lr)
        loc_row = jnp.tile(loc_sum, (1, k))
        ls_row = jnp.tile(ls_sum, (1, k))
        hiv_row = jnp.tile(hiv, (1, k))
    else:
        nu_r, z_r = nu, z
        loc_row, ls_row, hiv_row = loc_sum, ls_sum, hiv

    sub_g = max(_sublane_granule(nu_r.dtype), _sublane_granule(z_r.dtype), 8)

    aligned = (Lr % 128 == 0) and (Br % sub_g == 0)
    # "small": whole problem fits in one modest block (<= 2 MiB f32 per stream).
    small = (Br * Lr) <= 512 * 1024

    if aligned:
        # Tiled, no padding, no slicing. Lane axis is the wide one; batch axis gets >= 2
        # grid steps when possible so both v7x TensorCores are fed.
        tl = _pick_tile(Lr, 1024, 128)
        tb = _pick_tile(Br, 512, sub_g, min_steps=2 if Br >= 2 * sub_g else 1)
        out = _call(nu_r, z_r, loc_row, ls_row, hiv_row, tb, tl)
    elif small:
        # Single block equal to the full (ragged) array dims: legal and needs no padding.
        out = _call(nu_r, z_r, loc_row, ls_row, hiv_row, Br, Lr)
    else:
        # Fallback for large, ragged, non-packable shapes: minimal pad + slice.
        Lp = _round_up(Lr, 128)
        Bp = _round_up(Br, sub_g)
        tl = _pick_tile(Lp, 1024, 128)
        tb = _pick_tile(Bp, 512, sub_g, min_steps=2 if Bp >= 2 * sub_g else 1)

        def _pad2(x, rows, cols):
            return jnp.pad(x, ((0, rows - x.shape[0]), (0, cols - x.shape[1])))

        out_p = _call(_pad2(nu_r, Bp, Lp), _pad2(z_r, Bp, Lp),
                      _pad2(loc_row, 1, Lp), _pad2(ls_row, 1, Lp), _pad2(hiv_row, 1, Lp),
                      tb, tl)
        out = out_p[:Br, :Lr]

    return out.reshape(B, L) if k > 1 else out


def _reference(nu, z, loc, log_scale):
    mask = (z > 0).astype(jnp.float32)[..., None]            # (B, L, 1)
    loc_eff = jnp.sum(loc[None] * mask, axis=-1)             # (B, L)
    ls_eff = jnp.sum(log_scale[None] * mask, axis=-1)
    scale = jnp.exp(ls_eff)
    var = scale * scale
    return (-0.5 * jnp.log(2.0 * math.pi * var)
            - (nu.astype(jnp.float32) - loc_eff) ** 2 / (2.0 * var))


if __name__ == "__main__":
    # Module config: latent_shape = (L,), scale hyperparameter.
    L = 32
    B = 8
    scale_hyper = 0.1
    latent_shape = (L,)

    # reset_parameters(): gain = sqrt(2) (relu), fan_out = loc.size(0) = L
    gain = math.sqrt(2.0)
    std = gain / math.sqrt(L)
    loc_mean = math.log(scale_hyper)

    key = jax.random.PRNGKey(0)
    k_loc, k_ls, k_nu, k_z = jax.random.split(key, 4)

    loc = std * jax.random.normal(k_loc, latent_shape + (2,), dtype=jnp.float32)
    log_scale = loc_mean + std * jax.random.normal(k_ls, latent_shape + (2,),
                                                   dtype=jnp.float32)

    nu = jax.random.normal(k_nu, (B, L), dtype=jnp.float32)
    z = jax.random.normal(k_z, (B, L), dtype=jnp.float32)   # binary outcome decided by (z > 0)

    out = binary_distribution_forward(nu, z, loc, log_scale)
    out = jax.block_until_ready(out)

    ref = _reference(nu, z, loc, log_scale)
    assert out.shape == (B, L)
    assert jnp.allclose(out, ref, atol=1e-5, rtol=1e-5), "mismatch vs reference"

    print("KERNEL_OK")
</pallas_src>

<mosaic_0001>
module attributes {stable_mosaic.version = 11 : i64} {
  func.func @_binary_dist_kernel(%arg0: i32, %arg1: i32, %arg2: memref<2x128xf32, #tpu.memory_space<vmem>>, %arg3: memref<2x128xf32, #tpu.memory_space<vmem>>, %arg4: memref<1x128xf32, #tpu.memory_space<vmem>>, %arg5: memref<1x128xf32, #tpu.memory_space<vmem>>, %arg6: memref<1x128xf32, #tpu.memory_space<vmem>>, %arg7: memref<2x128xf32, #tpu.memory_space<vmem>>) attributes {dimension_semantics = [#tpu.dimension_semantics<parallel>, #tpu.dimension_semantics<parallel>], iteration_bounds = array<i64: 1, 1>, scalar_prefetch = 0 : i64, scratch_operands = 0 : i64, tpu.core_type = #tpu.core_type<tc>, window_params = [{transform_indices = @transform_0, window_bounds = array<i64: 2, 128>}, {transform_indices = @transform_1, window_bounds = array<i64: 2, 128>}, {transform_indices = @transform_2, window_bounds = array<i64: 1, 128>}, {transform_indices = @transform_3, window_bounds = array<i64: 1, 128>}, {transform_indices = @transform_4, window_bounds = array<i64: 1, 128>}, {transform_indices = @transform_5, window_bounds = array<i64: 2, 128>}]} {
    %c0 = arith.constant 0 : index
    %c0_0 = arith.constant 0 : index
    %0 = vector.load %arg3[%c0, %c0_0] : memref<2x128xf32, #tpu.memory_space<vmem>>, vector<2x128xf32>
    %cst = arith.constant 0.000000e+00 : f32
    %1 = vector.broadcast %cst : f32 to vector<2x128xf32>
    %2 = arith.cmpf ogt, %0, %1 : vector<2x128xf32>
    %c0_1 = arith.constant 0 : index
    %c0_2 = arith.constant 0 : index
    %3 = vector.load %arg4[%c0_1, %c0_2] : memref<1x128xf32, #tpu.memory_space<vmem>>, vector<1x128xf32>
    %cst_3 = arith.constant 0.000000e+00 : f32
    %4 = vector.shape_cast %3 : vector<1x128xf32> to vector<1x128xf32>
    %5 = vector.broadcast %4 : vector<1x128xf32> to vector<2x128xf32>
    %6 = vector.broadcast %cst_3 : f32 to vector<2x128xf32>
    %7 = arith.select %2, %5, %6 : vector<2x128xi1>, vector<2x128xf32>
    %c0_4 = arith.constant 0 : index
    %c0_5 = arith.constant 0 : index
    %8 = vector.load %arg5[%c0_4, %c0_5] : memref<1x128xf32, #tpu.memory_space<vmem>>, vector<1x128xf32>
    %cst_6 = arith.constant 0.000000e+00 : f32
    %9 = vector.shape_cast %8 : vector<1x128xf32> to vector<1x128xf32>
    %10 = vector.broadcast %9 : vector<1x128xf32> to vector<2x128xf32>
    %11 = vector.broadcast %cst_6 : f32 to vector<2x128xf32>
    %12 = arith.select %2, %10, %11 : vector<2x128xi1>, vector<2x128xf32>
    %c0_7 = arith.constant 0 : index
    %c0_8 = arith.constant 0 : index
    %13 = vector.load %arg6[%c0_7, %c0_8] : memref<1x128xf32, #tpu.memory_space<vmem>>, vector<1x128xf32>
    %cst_9 = arith.constant 5.000000e-01 : f32
    %14 = vector.shape_cast %13 : vector<1x128xf32> to vector<1x128xf32>
    %15 = vector.broadcast %14 : vector<1x128xf32> to vector<2x128xf32>
    %16 = vector.broadcast %cst_9 : f32 to vector<2x128xf32>
    %17 = arith.select %2, %15, %16 : vector<2x128xi1>, vector<2x128xf32>
    %c0_10 = arith.constant 0 : index
    %c0_11 = arith.constant 0 : index
    %18 = vector.load %arg2[%c0_10, %c0_11] : memref<2x128xf32, #tpu.memory_space<vmem>>, vector<2x128xf32>
    %19 = arith.subf %18, %7 : vector<2x128xf32>
    %cst_12 = arith.constant -0.918938517 : f32
    %20 = vector.broadcast %cst_12 : f32 to vector<2x128xf32>
    %21 = arith.subf %20, %12 : vector<2x128xf32>
    %22 = arith.mulf %19, %19 : vector<2x128xf32>
    %23 = arith.mulf %22, %17 : vector<2x128xf32>
    %24 = arith.subf %21, %23 : vector<2x128xf32>
    %c0_13 = arith.constant 0 : index
    %c0_14 = arith.constant 0 : index
    %25 = vector.load %arg7[%c0_13, %c0_14] : memref<2x128xf32, #tpu.memory_space<vmem>>, vector<2x128xf32>
    tpu.vector_store %arg7[%c0_13, %c0_14], %24 {strides = array<i32>} : memref<2x128xf32, #tpu.memory_space<vmem>>, vector<2x128xf32>,
    return
  }
  func.func @transform_0(%arg0: i32, %arg1: i32) -> (i32, i32) {
    %c0_i32 = arith.constant 0 : i32
    return %arg0, %arg1 : i32, i32
  }
  func.func @transform_1(%arg0: i32, %arg1: i32) -> (i32, i32) {
    %c0_i32 = arith.constant 0 : i32
    return %arg0, %arg1 : i32, i32
  }
  func.func @transform_2(%arg0: i32, %arg1: i32) -> (i32, i32) {
    %c0_i32 = arith.constant 0 : i32
    %c0_i32_0 = arith.constant 0 : i32
    return %c0_i32, %arg1 : i32, i32
  }
  func.func @transform_3(%arg0: i32, %arg1: i32) -> (i32, i32) {
    %c0_i32 = arith.constant 0 : i32
    %c0_i32_0 = arith.constant 0 : i32
    return %c0_i32, %arg1 : i32, i32
  }
  func.func @transform_4(%arg0: i32, %arg1: i32) -> (i32, i32) {
    %c0_i32 = arith.constant 0 : i32
    %c0_i32_0 = arith.constant 0 : i32
    return %c0_i32, %arg1 : i32, i32
  }
  func.func @transform_5(%arg0: i32, %arg1: i32) -> (i32, i32) {
    %c0_i32 = arith.constant 0 : i32
    return %arg0, %arg1 : i32, i32
  }
}

</mosaic_0001>

<bundles_post_ra>
// kernel: tpu_custom_call.1
= control target key start
LH: loop header
LB: loop body
LE: loop exit
PB: predicated region body
PF: predicated region fallthrough
CT: control target
= control target key end

     0   :  { %10 = vsyncpa [#allocation3], 0  ;;  %s217_s0 = inlined_call_operand.hbm [shape: f32[2,128], index: 0, kind: input, shape index: {}]   ;;  %s218_s1 = inlined_call_operand.hbm [shape: f32[2,128], index: 1, kind: input, shape index: {}]   ;;  %s219_s2 = inlined_call_operand.vmem [shape: f32[1,128], index: 2, kind: input, shape index: {}]   ;;  %s220_s3 = inlined_call_operand.vmem [shape: f32[1,128], index: 3, kind: input, shape index: {}]   ;;  %s221_s4 = inlined_call_operand.vmem [shape: f32[1,128], index: 4, kind: input, shape index: {}]   ;;  %s222_s5 = inlined_call_operand.hbm [shape: f32[2,128], index: 5, kind: output, shape index: {}]  }
   0x1   :  { %11 = vsyncpa [#allocation6], 0 }
   0x2   :  { %12 = vsyncpa [#allocation4], 0  ;;  %s166_s18 = smov [#allocation2]   ;;  %s167_s20 = smov [#allocation5]  }
   0x3   :  { %s19_s19 = sshll.u32 %s166_s18, 4  ;;  %s29_s21 = sshll.u32 %s167_s20, 4  ;;  %s20_s19 = int_to_ptr.vmem [resolvable:$true] %s19_s19  ;;  %s30_s21 = int_to_ptr.vmem [resolvable:$true] %s29_s21 }
   0x4   :  { %s108_s22 = scalar_lea.vmem %s20_s19, 32  ;;  %p113_p1 = scmp.lt.s32.totalorder %s20_s19, %s20_s19 }
   0x5   :  { %p109_p0 = scmp.ne.s32.totalorder %s20_s19, %s108_s22  ;;  %p114_p2 = scmp.lt.s32.totalorder %s108_s22, %s108_s22 }
   0x7   :  { %p115_p3 = por %p114_p2, %p113_p1 }
   0x9   :  { %p116_p4 = pnand %p115_p3, %p109_p0 }
   0xb   :  { %119 = shalt.err (!%p116_p4)
}
   0xc   :  { %22 = dma.hbm_to_vmem [thread:$0]  %s217_s0, 32, %s20_s19, [#allocation3]  }
   0xd   :  { %s128_s25 = scalar_lea.vmem %s30_s21, 32  ;;  %p133_p6 = scmp.lt.s32.totalorder %s30_s21, %s30_s21 }
   0xe   :  { %p129_p5 = scmp.ne.s32.totalorder %s30_s21, %s128_s25  ;;  %p134_p7 = scmp.lt.s32.totalorder %s128_s25, %s128_s25 }
  0x10   :  { %p135_p8 = por %p134_p7, %p133_p6 }
  0x12   :  { %p136_p9 = pnand %p135_p8, %p129_p5 }
  0x14   :  { %139 = shalt.err (!%p136_p9)
}
  0x15   :  { %32 = dma.hbm_to_vmem [thread:$0]  %s218_s1, 32, %s30_s21, [#allocation6]  }
  0x16   :  { %160 = dma.done.wait [#allocation3], 32  }
  0x17   :  { %161 = vsyncadd [#allocation3], 4294967264 }
  0x18   :  { %162 = dma.done.wait [#allocation6], 32  }
  0x19   :  { %163 = vsyncadd [#allocation6], 4294967264  ;;  %v45_v0 = vld [vmem:[#allocation5] sm:$0x3]  ;;  %v94_v1 = vld [vmem:[%s219_s2] ss:$0 sm:$0xff] }
  0x1a   :  { %v95_v2 = vld [vmem:[%s220_s3] ss:$0 sm:$0xff]  ;;  %vm46_vm0 = vcmp.gt.f32.partialorder %v45_v0, 0.0  ;;  %s168_s1 = smov [#allocation7]  }
  0x1b   :  { %v96_v3 = vld [vmem:[%s221_s4] ss:$0 sm:$0xff]  ;;  %v54_v5 = vsel %vm46_vm0, %v94_v1, 0.0  ;;  %v62_v6 = vsel %vm46_vm0, %v95_v2, 0.0  ;;  %s84_s8 = sshll.u32 %s168_s1, 4  ;;  %s85_s8 = int_to_ptr.vmem [resolvable:$true] %s84_s8 }
  0x1c   :  { %v71_v4 = vld [vmem:[#allocation2] sm:$0x3]  ;;  %v70_v8 = vsel %vm46_vm0, %v96_v3, 0.5  ;;  %v73_v9 = vsub.f32 -0.9189385, %v62_v6  ;;  %s140_s2 = scalar_lea.vmem %s85_s8, 32  ;;  %p145_p11 = scmp.lt.s32.totalorder %s85_s8, %s85_s8 }
  0x1d   :  { %v72_v7 = vsub.f32 %v71_v4, %v54_v5  ;;  %p141_p10 = scmp.ne.s32.totalorder %s85_s8, %s140_s2  ;;  %p146_p12 = scmp.lt.s32.totalorder %s140_s2, %s140_s2 }
  0x1f   :  { %v74_v10 = vmul.f32 %v72_v7, %v72_v7  ;;  %p147_p13 = por %p146_p12, %p145_p11 }
  0x21   :  { %v75_v11 = vmul.f32 %v74_v10, %v70_v8  ;;  %p148_p0 = pnand %p147_p13, %p141_p10 }
  0x23   :  { %v76_v12 = vsub.f32 %v73_v9, %v75_v11 }
  0x25   :  { %77 = vst [vmem:[#allocation7] sm:$0x3] %v76_v12 }
  0x26   :  { %151 = shalt.err (!%p148_p0)
}
  0x27   :  { %87 = dma.vmem_to_hbm [thread:$0]  %s85_s8, 32, %s222_s5, [#allocation4]  }
  0x28   :  { %164 = dma.done.wait [#allocation4], 32  }
  0x29   :  { %165 = vsyncadd [#allocation4], 4294967264 }
  0x2a   :  { %91 = vsyncpa [#allocation3], 1 }
  0x2b   :  { %92 = vsyncpa [#allocation6], 1 }
  0x2c   :  { %93 = vsyncpa [#allocation4], 1 }

</bundles_post_ra>
